<compile_context>
chip_gen: v5e
topology: v5e:2x2
jax: 0.10.0
libtpu: 0.0.40
codegen_flags: <defaults>
</compile_context>

<pallas_src>
import jax
import jax.numpy as jnp
from jax.experimental import pallas as pl
from jax.experimental.pallas import tpu as pltpu


def _round_up(a, m):
    return (a + m - 1) // m * m


def _tpu_flavor():
    """Returns (two_tensorcores_per_chip, wide_256_mxu); conservative on failure."""
    try:
        kind = jax.devices()[0].device_kind.lower()
    except Exception:
        return False, False
    two_tc = ("v7" in kind) or ("7x" in kind) or ("tpu7" in kind)
    wide_mxu = two_tc or ("v6" in kind)
    return two_tc, wide_mxu


def _make_kernel(P, n_bins, mxu_bf16, approx_recip):
    mxu_dtype = jnp.bfloat16 if mxu_bf16 else jnp.float32

    def kernel(x_ref, selw1b_ref, w2_ref, b2_ref, sel_ref, emb_ref, segd_ref,
               o_ref):
        # x_ref: (blk, P+1) — P packed scalar inputs per row + a ones column,
        # so the Linear(1, n_bins) bias is folded into the first matmul.
        x = x_ref[...].astype(mxu_dtype)

        # Linear(1, n_bins) for all P segments at once (scalar -> n_bins-wide
        # segment expansion fused with the w1 multiply and b1 on the host).
        h1 = jnp.dot(x, selw1b_ref[...], preferred_element_type=jnp.float32)
        h1 = jnp.maximum(h1, 0.0)                                   # ReLU

        # Linear(n_bins, n_bins) as one block-diagonal (P*nb, P*nb) matmul.
        h2 = jnp.dot(h1.astype(mxu_dtype), w2_ref[...],
                     preferred_element_type=jnp.float32) + b2_ref[...]

        # Per-segment max for softmax stability: P narrow slices + XLU
        # reductions, then a single tiny K=P matmul against the 0/1 selector
        # to broadcast each max back over its segment (no VALU mult/add chain).
        maxes = [jnp.max(h2[:, j * n_bins:(j + 1) * n_bins],
                         axis=-1, keepdims=True) for j in range(P)]
        m_stack = jnp.concatenate(maxes, axis=-1)                   # (blk, P)
        m_full = jnp.dot(m_stack.astype(mxu_dtype), sel_ref[...],
                         preferred_element_type=jnp.float32)
        # Any rounding of m_full is a per-segment constant shift and cancels
        # exactly in num/den below.

        e = jnp.exp(h2 - m_full)                                    # f32, EUP
        e_m = e.astype(mxu_dtype)

        # Normalize AFTER the embedding matmul: both matmuls depend only on
        # `e`, so they issue back-to-back on the MXU (no MXU->EUP->VALU->MXU
        # serialization) and the softmax probabilities never materialize.
        num = jnp.dot(e_m, emb_ref[...], preferred_element_type=jnp.float32)
        den = jnp.dot(e_m, segd_ref[...], preferred_element_type=jnp.float32)
        if approx_recip:
            o_ref[...] = num * pl.reciprocal(den, approx=True)      # EUP slot
        else:
            o_ref[...] = num / den

    return kernel


def soft_binned_gene_embedding(x, w1, b1, w2, b2, emb, *,
                               mxu_bf16=False, approx_recip=True,
                               max_block_rows=4096):
    """x: (..., 1) float32 -> (..., emb_dim) float32."""
    orig_shape = x.shape
    assert orig_shape[-1] == 1
    n_bins, emb_dim = emb.shape
    f32 = jnp.float32
    w1 = w1.reshape(1, n_bins).astype(f32)
    b1 = b1.reshape(1, n_bins).astype(f32)
    b2 = b2.reshape(1, n_bins).astype(f32)
    w2 = w2.astype(f32)
    emb = emb.astype(f32)

    two_tc, wide_mxu = _tpu_flavor()

    # Packing factor: fill 128 output lanes (256 when bf16 operands feed a
    # 256-wide MXU on v6e/v7x).  Falls back to P=1 (perf cliff only) when
    # emb_dim does not divide the lane target.
    target = 256 if (mxu_bf16 and wide_mxu) else 128
    if emb_dim <= target and target % emb_dim == 0:
        P = target // emb_dim
    elif emb_dim < 128 and 128 % emb_dim == 0:
        P = 128 // emb_dim
    else:
        P = 1

    nbp = P * n_bins
    edp = P * emb_dim

    x_flat = x.reshape(-1).astype(f32)
    M = x_flat.shape[0]
    np_needed = max(1, -(-M // P))

    # --- Row tile from a VMEM budget (feedback: was overhead-bound at 256). ---
    # Row-proportional bytes: double-buffered input/output blocks plus the
    # in-kernel f32 intermediates (h1, h2, e, m_full, num, den).  A 20 MiB
    # row budget keeps total usage under the 32 MiB scoped limit everywhere
    # (including v7x's 64 MiB physical VMEM), weights included.
    per_row = 4 * (2 * (P + 1) + 2 * edp + 4 * nbp + 2 * edp)
    budget_rows = max(8, (20 * 1024 * 1024 // per_row) // 8 * 8)
    blk_cap = max(8, min(int(max_block_rows), budget_rows))

    if np_needed <= blk_cap:
        if two_tc and np_needed >= 512:
            # v7x only: two balanced steps so both TensorCores get a share.
            blk = _round_up(-(-np_needed // 2), 8)
        else:
            # Single-TC chips (v5e/v6e) or small work: one grid step.
            blk = _round_up(np_needed, 8)
    else:
        blk = blk_cap
    Np = _round_up(np_needed, blk)
    grid = Np // blk

    pad = Np * P - M
    if pad:
        x_flat = jnp.pad(x_flat, (0, pad))
    xp = x_flat.reshape(Np, P)
    # Ones column folds the Linear(1, n_bins) bias into the first matmul.
    x_aug = jnp.concatenate([xp, jnp.ones((Np, 1), f32)], axis=-1)

    # Block-replicated parameters, built once on the host.
    eyeP = jnp.eye(P, dtype=f32)
    sel = jnp.kron(eyeP, jnp.ones((1, n_bins), f32))                # (P, nbp)
    selw1 = sel * jnp.tile(w1, (1, P))                              # (P, nbp)
    selw1b = jnp.concatenate([selw1, jnp.tile(b1, (1, P))], axis=0)  # (P+1, nbp)
    w2_blk = jnp.kron(eyeP, w2)                                     # (nbp, nbp)
    b2_t = jnp.tile(b2, (1, P))                                     # (1, nbp)
    emb_blk = jnp.kron(eyeP, emb)                                   # (nbp, edp)
    seg_ed = jnp.kron(eyeP, jnp.ones((n_bins, emb_dim), f32))       # (nbp, edp)

    mxu_dtype = jnp.bfloat16 if mxu_bf16 else f32
    selw1b = selw1b.astype(mxu_dtype)
    w2_blk = w2_blk.astype(mxu_dtype)
    sel = sel.astype(mxu_dtype)
    emb_blk = emb_blk.astype(mxu_dtype)
    seg_ed = seg_ed.astype(mxu_dtype)

    wbytes = 2 if mxu_bf16 else 4
    cost = pl.CostEstimate(
        flops=int(Np * (2 * (P + 1) * nbp + 2 * nbp * nbp + 2 * P * nbp
                        + 4 * nbp * edp)),
        transcendentals=int(Np * (nbp + edp)),
        bytes_accessed=int(4 * Np * (P + 1 + edp)
                           + wbytes * (2 * P * nbp + nbp * nbp + 2 * nbp * edp)
                           + 4 * nbp),
    )

    out_packed = pl.pallas_call(
        _make_kernel(P, n_bins, mxu_bf16, approx_recip),
        out_shape=jax.ShapeDtypeStruct((Np, edp), f32),
        grid_spec=pltpu.PrefetchScalarGridSpec(
            num_scalar_prefetch=0,
            grid=(grid,),
            in_specs=[
                pl.BlockSpec((blk, P + 1), lambda i: (i, 0)),   # packed x + 1s
                pl.BlockSpec((P + 1, nbp), lambda i: (0, 0)),   # [sel*w1; b1]
                pl.BlockSpec((nbp, nbp), lambda i: (0, 0)),     # blockdiag w2
                pl.BlockSpec((1, nbp), lambda i: (0, 0)),       # b2 tiled
                pl.BlockSpec((P, nbp), lambda i: (0, 0)),       # 0/1 selector
                pl.BlockSpec((nbp, edp), lambda i: (0, 0)),     # blockdiag emb
                pl.BlockSpec((nbp, edp), lambda i: (0, 0)),     # per-seg sum
            ],
            out_specs=pl.BlockSpec((blk, edp), lambda i: (i, 0)),
        ),
        compiler_params=pltpu.CompilerParams(
            dimension_semantics=("parallel",),
            vmem_limit_bytes=32 * 1024 * 1024),
        cost_estimate=cost,
    )(x_aug, selw1b, w2_blk, b2_t, sel, emb_blk, seg_ed)

    out = out_packed.reshape(Np * P, emb_dim)
    if pad:  # only slice (possible copy) when padding actually happened
        out = out[:M]
    return out.reshape(*orig_shape[:-1], emb_dim)


def _ref(x, w1, b1, w2, b2, emb):
    h1 = jnp.maximum(x @ w1 + b1, 0.0)
    h2 = h1 @ w2 + b2
    p = jax.nn.softmax(h2, axis=-1)
    return p @ emb


if __name__ == "__main__":
    n_bins, emb_dim = 32, 32

    key = jax.random.PRNGKey(0)
    kx, k1, k2, k3, k4, k5, kx2 = jax.random.split(key, 7)

    # Deterministic synthetic parameters (shapes match the PyTorch module).
    w1 = jax.random.normal(k1, (1, n_bins), dtype=jnp.float32) * 0.5
    b1 = jax.random.normal(k2, (1, n_bins), dtype=jnp.float32) * 0.1
    w2 = jax.random.normal(k3, (n_bins, n_bins), dtype=jnp.float32) * (1.0 / n_bins ** 0.5)
    b2 = jax.random.normal(k4, (1, n_bins), dtype=jnp.float32) * 0.1
    emb = jax.random.normal(k5, (n_bins, emb_dim), dtype=jnp.float32)

    # 1) Small shape — single grid step.
    B, S = 2, 8
    x = jax.random.normal(kx, (B, S, 1), dtype=jnp.float32)
    out = jax.block_until_ready(soft_binned_gene_embedding(x, w1, b1, w2, b2, emb))
    ref = _ref(x.reshape(-1, 1), w1, b1, w2, b2, emb).reshape(B, S, emb_dim)
    assert out.shape == (B, S, emb_dim)
    # Tolerance loosened slightly for pl.reciprocal(approx=True).
    assert jnp.allclose(out, ref, atol=2e-3, rtol=2e-3), "small f32 mismatch"

    # 2) Larger shape — exercises row padding.
    B2, S2 = 4, 300
    x2 = jax.random.normal(kx2, (B2, S2, 1), dtype=jnp.float32)
    ref2 = _ref(x2.reshape(-1, 1), w1, b1, w2, b2, emb).reshape(B2, S2, emb_dim)
    out2 = jax.block_until_ready(soft_binned_gene_embedding(x2, w1, b1, w2, b2, emb))
    assert out2.shape == (B2, S2, emb_dim)
    assert jnp.allclose(out2, ref2, atol=2e-3, rtol=2e-3), "large f32 mismatch"

    # 3) Force a multi-step grid (small per-step tile) — identical numerics.
    out3 = jax.block_until_ready(
        soft_binned_gene_embedding(x2, w1, b1, w2, b2, emb, max_block_rows=64))
    assert jnp.allclose(out3, ref2, atol=2e-3, rtol=2e-3), "multi-step mismatch"

    # 4) Optional fast path: bf16 MXU operands (f32 accumulation). Coarse
    #    check only — this path trades ~1e-2 relative accuracy for MXU speed.
    out4 = jax.block_until_ready(
        soft_binned_gene_embedding(x2, w1, b1, w2, b2, emb, mxu_bf16=True))
    assert jnp.allclose(out4, ref2, atol=1e-1, rtol=1e-1), "bf16 mismatch"

    print("KERNEL_OK")
</pallas_src>

<mosaic_0001>
module attributes {stable_mosaic.version = 11 : i64} {
  func.func @kernel(%arg0: i32, %arg1: memref<8x5xf32, #tpu.memory_space<vmem>>, %arg2: memref<5x128xf32, #tpu.memory_space<vmem>>, %arg3: memref<128x128xf32, #tpu.memory_space<vmem>>, %arg4: memref<1x128xf32, #tpu.memory_space<vmem>>, %arg5: memref<4x128xf32, #tpu.memory_space<vmem>>, %arg6: memref<128x128xf32, #tpu.memory_space<vmem>>, %arg7: memref<128x128xf32, #tpu.memory_space<vmem>>, %arg8: memref<8x128xf32, #tpu.memory_space<vmem>>) attributes {dimension_semantics = [#tpu.dimension_semantics<parallel>], iteration_bounds = array<i64: 1>, scalar_prefetch = 0 : i64, scratch_operands = 0 : i64, tpu.core_type = #tpu.core_type<tc>, window_params = [{transform_indices = @transform_0, window_bounds = array<i64: 8, 5>}, {pipeline_mode = #tpu.pipeline_mode<synchronous>, transform_indices = @transform_1, window_bounds = array<i64: 5, 128>}, {pipeline_mode = #tpu.pipeline_mode<synchronous>, transform_indices = @transform_2, window_bounds = array<i64: 128, 128>}, {pipeline_mode = #tpu.pipeline_mode<synchronous>, transform_indices = @transform_3, window_bounds = array<i64: 1, 128>}, {pipeline_mode = #tpu.pipeline_mode<synchronous>, transform_indices = @transform_4, window_bounds = array<i64: 4, 128>}, {pipeline_mode = #tpu.pipeline_mode<synchronous>, transform_indices = @transform_5, window_bounds = array<i64: 128, 128>}, {pipeline_mode = #tpu.pipeline_mode<synchronous>, transform_indices = @transform_6, window_bounds = array<i64: 128, 128>}, {transform_indices = @transform_7, window_bounds = array<i64: 8, 128>}]} {
    %c0 = arith.constant 0 : index
    %c0_0 = arith.constant 0 : index
    %0 = vector.load %arg1[%c0, %c0_0] : memref<8x5xf32, #tpu.memory_space<vmem>>, vector<8x5xf32>
    %c0_1 = arith.constant 0 : index
    %c0_2 = arith.constant 0 : index
    %1 = vector.load %arg2[%c0_1, %c0_2] : memref<5x128xf32, #tpu.memory_space<vmem>>, vector<5x128xf32>
    %cst = arith.constant dense<0.000000e+00> : vector<8x128xf32>
    %2 = tpu.matmul %0, %1, %cst {dimension_numbers = #tpu.dot_dimension_numbers<[1], [0], [0], [1], [0, 0, 1, 1], [], []>} : vector<8x5xf32>, vector<5x128xf32>, vector<8x128xf32> -> vector<8x128xf32>
    %cst_3 = arith.constant 0.000000e+00 : f32
    %3 = vector.broadcast %cst_3 : f32 to vector<8x128xf32>
    %4 = arith.maximumf %2, %3 : vector<8x128xf32>
    %c0_4 = arith.constant 0 : index
    %c0_5 = arith.constant 0 : index
    %5 = vector.load %arg3[%c0_4, %c0_5] : memref<128x128xf32, #tpu.memory_space<vmem>>, vector<128x128xf32>
    %cst_6 = arith.constant dense<0.000000e+00> : vector<8x128xf32>
    %6 = tpu.matmul %4, %5, %cst_6 {dimension_numbers = #tpu.dot_dimension_numbers<[1], [0], [0], [1], [0, 0, 1, 1], [], []>} : vector<8x128xf32>, vector<128x128xf32>, vector<8x128xf32> -> vector<8x128xf32>
    %c0_7 = arith.constant 0 : index
    %c0_8 = arith.constant 0 : index
    %7 = vector.load %arg4[%c0_7, %c0_8] : memref<1x128xf32, #tpu.memory_space<vmem>>, vector<1x128xf32>
    %8 = vector.broadcast %7 : vector<1x128xf32> to vector<8x128xf32>
    %9 = arith.addf %6, %8 : vector<8x128xf32>
    %10 = vector.extract_strided_slice %9 {offsets = [0, 0], sizes = [8, 32], strides = [1, 1]} : vector<8x128xf32> to vector<8x32xf32>
    %cst_9 = arith.constant dense<0xFF800000> : vector<8xf32>
    %11 = vector.multi_reduction <maximumf>, %10, %cst_9 [1] : vector<8x32xf32> to vector<8xf32>
    %12 = vector.shape_cast %11 : vector<8xf32> to vector<8x1xf32>
    %13 = vector.extract_strided_slice %9 {offsets = [0, 32], sizes = [8, 32], strides = [1, 1]} : vector<8x128xf32> to vector<8x32xf32>
    %cst_10 = arith.constant dense<0xFF800000> : vector<8xf32>
    %14 = vector.multi_reduction <maximumf>, %13, %cst_10 [1] : vector<8x32xf32> to vector<8xf32>
    %15 = vector.shape_cast %14 : vector<8xf32> to vector<8x1xf32>
    %16 = vector.extract_strided_slice %9 {offsets = [0, 64], sizes = [8, 32], strides = [1, 1]} : vector<8x128xf32> to vector<8x32xf32>
    %cst_11 = arith.constant dense<0xFF800000> : vector<8xf32>
    %17 = vector.multi_reduction <maximumf>, %16, %cst_11 [1] : vector<8x32xf32> to vector<8xf32>
    %18 = vector.shape_cast %17 : vector<8xf32> to vector<8x1xf32>
    %19 = vector.extract_strided_slice %9 {offsets = [0, 96], sizes = [8, 32], strides = [1, 1]} : vector<8x128xf32> to vector<8x32xf32>
    %cst_12 = arith.constant dense<0xFF800000> : vector<8xf32>
    %20 = vector.multi_reduction <maximumf>, %19, %cst_12 [1] : vector<8x32xf32> to vector<8xf32>
    %21 = vector.shape_cast %20 : vector<8xf32> to vector<8x1xf32>
    %22 = tpu.concatenate %12, %15, %18, %21 in 1 : vector<8x1xf32>, vector<8x1xf32>, vector<8x1xf32>, vector<8x1xf32> -> vector<8x4xf32>
    %c0_13 = arith.constant 0 : index
    %c0_14 = arith.constant 0 : index
    %23 = vector.load %arg5[%c0_13, %c0_14] : memref<4x128xf32, #tpu.memory_space<vmem>>, vector<4x128xf32>
    %cst_15 = arith.constant dense<0.000000e+00> : vector<8x128xf32>
    %24 = tpu.matmul %22, %23, %cst_15 {dimension_numbers = #tpu.dot_dimension_numbers<[1], [0], [0], [1], [0, 0, 1, 1], [], []>} : vector<8x4xf32>, vector<4x128xf32>, vector<8x128xf32> -> vector<8x128xf32>
    %25 = arith.subf %9, %24 : vector<8x128xf32>
    %26 = math.exp %25 : vector<8x128xf32>
    %c0_16 = arith.constant 0 : index
    %c0_17 = arith.constant 0 : index
    %27 = vector.load %arg6[%c0_16, %c0_17] : memref<128x128xf32, #tpu.memory_space<vmem>>, vector<128x128xf32>
    %cst_18 = arith.constant dense<0.000000e+00> : vector<8x128xf32>
    %28 = tpu.matmul %26, %27, %cst_18 {dimension_numbers = #tpu.dot_dimension_numbers<[1], [0], [0], [1], [0, 0, 1, 1], [], []>} : vector<8x128xf32>, vector<128x128xf32>, vector<8x128xf32> -> vector<8x128xf32>
    %c0_19 = arith.constant 0 : index
    %c0_20 = arith.constant 0 : index
    %29 = vector.load %arg7[%c0_19, %c0_20] : memref<128x128xf32, #tpu.memory_space<vmem>>, vector<128x128xf32>
    %cst_21 = arith.constant dense<0.000000e+00> : vector<8x128xf32>
    %30 = tpu.matmul %26, %29, %cst_21 {dimension_numbers = #tpu.dot_dimension_numbers<[1], [0], [0], [1], [0, 0, 1, 1], [], []>} : vector<8x128xf32>, vector<128x128xf32>, vector<8x128xf32> -> vector<8x128xf32>
    %31 = tpu.reciprocal %30 {approx = true} : vector<8x128xf32> -> vector<8x128xf32>
    %32 = arith.mulf %28, %31 : vector<8x128xf32>
    %c0_22 = arith.constant 0 : index
    %c0_23 = arith.constant 0 : index
    %33 = vector.load %arg8[%c0_22, %c0_23] : memref<8x128xf32, #tpu.memory_space<vmem>>, vector<8x128xf32>
    tpu.vector_store %arg8[%c0_22, %c0_23], %32 {strides = array<i32>} : memref<8x128xf32, #tpu.memory_space<vmem>>, vector<8x128xf32>,
    return
  }
  func.func @transform_0(%arg0: i32) -> (i32, i32) {
    %c0_i32 = arith.constant 0 : i32
    %c0_i32_0 = arith.constant 0 : i32
    return %arg0, %c0_i32 : i32, i32
  }
  func.func @transform_1(%arg0: i32) -> (i32, i32) {
    %c0_i32 = arith.constant 0 : i32
    %c0_i32_0 = arith.constant 0 : i32
    %c0_i32_1 = arith.constant 0 : i32
    return %c0_i32, %c0_i32_0 : i32, i32
  }
  func.func @transform_2(%arg0: i32) -> (i32, i32) {
    %c0_i32 = arith.constant 0 : i32
    %c0_i32_0 = arith.constant 0 : i32
    %c0_i32_1 = arith.constant 0 : i32
    return %c0_i32, %c0_i32_0 : i32, i32
  }
  func.func @transform_3(%arg0: i32) -> (i32, i32) {
    %c0_i32 = arith.constant 0 : i32
    %c0_i32_0 = arith.constant 0 : i32
    %c0_i32_1 = arith.constant 0 : i32
    return %c0_i32, %c0_i32_0 : i32, i32
  }
  func.func @transform_4(%arg0: i32) -> (i32, i32) {
    %c0_i32 = arith.constant 0 : i32
    %c0_i32_0 = arith.constant 0 : i32
    %c0_i32_1 = arith.constant 0 : i32
    return %c0_i32, %c0_i32_0 : i32, i32
  }
  func.func @transform_5(%arg0: i32) -> (i32, i32) {
    %c0_i32 = arith.constant 0 : i32
    %c0_i32_0 = arith.constant 0 : i32
    %c0_i32_1 = arith.constant 0 : i32
    return %c0_i32, %c0_i32_0 : i32, i32
  }
  func.func @transform_6(%arg0: i32) -> (i32, i32) {
    %c0_i32 = arith.constant 0 : i32
    %c0_i32_0 = arith.constant 0 : i32
    %c0_i32_1 = arith.constant 0 : i32
    return %c0_i32, %c0_i32_0 : i32, i32
  }
  func.func @transform_7(%arg0: i32) -> (i32, i32) {
    %c0_i32 = arith.constant 0 : i32
    %c0_i32_0 = arith.constant 0 : i32
    return %arg0, %c0_i32 : i32, i32
  }
}

</mosaic_0001>

<bundles_post_ra>
// kernel: tpu_custom_call.1
= control target key start
LH: loop header
LB: loop body
LE: loop exit
PB: predicated region body
PF: predicated region fallthrough
CT: control target
= control target key end

     0   :  { %12 = vsyncpa [#allocation3], 0  ;;  %s611_s0 = inlined_call_operand.hbm [shape: f32[8,5], index: 0, kind: input, shape index: {}]   ;;  %s612_s1 = inlined_call_operand.hbm [shape: f32[5,128], index: 1, kind: input, shape index: {}]   ;;  %s613_s2 = inlined_call_operand.hbm [shape: f32[128,128], index: 2, kind: input, shape index: {}]   ;;  %s614_s3 = inlined_call_operand.vmem [shape: f32[1,128], index: 3, kind: input, shape index: {}]   ;;  %s615_s4 = inlined_call_operand.hbm [shape: f32[4,128], index: 4, kind: input, shape index: {}]   ;;  %s616_s5 = inlined_call_operand.hbm [shape: f32[128,128], index: 5, kind: input, shape index: {}]   ;;  %s617_s6 = inlined_call_operand.hbm [shape: f32[128,128], index: 6, kind: input, shape index: {}]   ;;  %s618_s7 = inlined_call_operand.hbm [shape: f32[8,128], index: 7, kind: output, shape index: {}]  }
   0x1   :  { %13 = vsyncpa [#allocation6], 0 }
   0x2   :  { %14 = vsyncpa [#allocation9], 0 }
   0x3   :  { %15 = vsyncpa [#allocation12], 0  ;;  %s33_s26 = sshll.u32 %s612_s1, 4  ;;  %s34_s26 = int_to_ptr.hbm [resolvable:$true] %s33_s26 }
   0x4   :  { %16 = vsyncpa [#allocation4], 0  ;;  %s531_s27 = smov [#allocation5]   ;;  %s59_s8 = sshll.u32 %s615_s4, 4  ;;  %s60_s8 = int_to_ptr.hbm [resolvable:$true] %s59_s8 }
   0x5   :  { %s35_s28 = sshll.u32 %s531_s27, 4  ;;  %s532_s9 = smov [#allocation8]   ;;  %s36_s28 = int_to_ptr.vmem [resolvable:$true] %s35_s28 }
   0x6   :  { %38 = dma.hbm_to_vmem [thread:$0]  %s34_s26, 128, %s36_s28, [#allocation6]  }
   0x7   :  { %s61_s10 = sshll.u32 %s532_s9, 4  ;;  %s22_s13 = sshll.u32 %s611_s0, 4  ;;  %s62_s10 = int_to_ptr.vmem [resolvable:$true] %s61_s10  ;;  %s23_s13 = int_to_ptr.hbm [resolvable:$true] %s22_s13 }
   0x8   :  { %64 = dma.hbm_to_vmem [thread:$0]  %s60_s8, 64, %s62_s10, [#allocation9]  }
   0x9   :  { %s43_s15 = sshll.u32 %s613_s2, 4  ;;  %s533_s16 = smov [#allocation2]   ;;  %s44_s15 = int_to_ptr.hbm [resolvable:$true] %s43_s15 }
   0xa   :  { %s24_s17 = sshll.u32 %s533_s16, 4  ;;  %s534_s4 = smov [#allocation7]   ;;  %s25_s17 = int_to_ptr.vmem [resolvable:$true] %s24_s17 }
   0xb   :  { %27 = dma.hbm_to_vmem [thread:$0]  %s23_s13, 128, %s25_s17, [#allocation3]  }
   0xc   :  { %s45_s18 = sshll.u32 %s534_s4, 4  ;;  %s535_s19 = smov 128   ;;  %s46_s18 = int_to_ptr.vmem [resolvable:$true] %s45_s18 }
   0xd   :  { %s536_s20 = smov 8   ;;  %s69_s22 = sshll.u32 %s616_s5, 4  ;;  %s70_s22 = int_to_ptr.hbm [resolvable:$true] %s69_s22 }
   0xe   :  { %51 = dma.hbm_to_vmem [thread:$0]  %s44_s15, 2048, %s46_s18, [#allocation6], %s535_s19, %s535_s19, %s536_s20  }
   0xf   :  { %s537_s23 = smov [#allocation10]   ;;  %s82_s26 = sshll.u32 %s617_s6, 4  ;;  %s83_s26 = int_to_ptr.hbm [resolvable:$true] %s82_s26 }
  0x10   :  { %s71_s24 = sshll.u32 %s537_s23, 4  ;;  %s538_s27 = smov [#allocation11]   ;;  %s72_s24 = int_to_ptr.vmem [resolvable:$true] %s71_s24 }
  0x11   :  { %77 = dma.hbm_to_vmem [thread:$0]  %s70_s22, 2048, %s72_s24, [#allocation9], %s535_s19, %s535_s19, %s536_s20  }
  0x12   :  { %s84_s28 = sshll.u32 %s538_s27, 4  ;;  %s85_s28 = int_to_ptr.vmem [resolvable:$true] %s84_s28 }
  0x13   :  { %90 = dma.hbm_to_vmem [thread:$0]  %s83_s26, 2048, %s85_s28, [#allocation12], %s535_s19, %s535_s19, %s536_s20  }
  0x14   :  { %521 = dma.done.wait [#allocation3], 128  }
  0x15   :  { %522 = vsyncadd [#allocation3], 4294967168 }
  0x16   :  { %523 = dma.done.wait [#allocation6], 2176  }
  0x17   :  { %524 = vsyncadd [#allocation6], 4294965120 }
  0x18   :  { %525 = dma.done.wait [#allocation9], 2112  }
  0x19   :  { %526 = vsyncadd [#allocation9], 4294965184 }
  0x1a   :  { %527 = dma.done.wait [#allocation12], 2048  }
  0x1b   :  { %528 = vsyncadd [#allocation12], 4294965248  ;;  %vm121_vm0 = vcmask 1044480   ;;  %vm117_vm1 = vcmask 39936   ;;  %v116_v0 = vld [vmem:[#allocation5] sm:$0x1f] }
  0x1c   :  { %v115_v1 = vld [vmem:[#allocation2] sm:$0xff]  ;;  %v161_v2 = vld [vmem:[#allocation7 + $0x78] sm:$0xff]  ;;  %335 = vmatpush.msk.msra.mxu2 %vm121_vm0, %v116_v0  ;;  %v159_v4 = vld [vmem:[#allocation7 + $0x68] sm:$0xff]  ;;  %vm194_vm2 = vcmask 785920   ;;  %vm186_vm3 = vcmask 261120   ;;  %vm198_vm4 = vcmask 1048320  }
  0x1d   :  { %166 = vmatpush.msra.mxu1 %v161_v2  ;;  %v160_v3 = vld [vmem:[#allocation7 + $0x70] sm:$0xff]  ;;  %336 = vmatmul.msk.f32.vlgmr.msra.gmra.mxu2 %vm117_vm1, %v115_v1  ;;  %v158_v5 = vld [vmem:[#allocation7 + $0x60] sm:$0xff]  ;;  %v157_v6 = vld [vmem:[#allocation7 + $0x58] sm:$0xff]  ;;  %vm190_vm5 = vcmask 523520   ;;  %vm213_vm6 = vcmask 1043456   ;;  %vm202_vm7 = vcmask 7168  }
  0x1e   :  { %v156_v7 = vld [vmem:[#allocation7 + $0x50] sm:$0xff]  ;;  %v155_v8 = vld [vmem:[#allocation7 + $0x48] sm:$0xff]  ;;  %v154_v9 = vld [vmem:[#allocation7 + $0x40] sm:$0xff]  ;;  %vm204_vm8 = vcmask 15360   ;;  %vm206_vm9 = vcmask 23552   ;;  %vm209_vm10 = vcmask 31744  }
  0x1f   :  { %167 = vmatpush.msra.mxu1 %v160_v3  ;;  %v153_v10 = vld [vmem:[#allocation7 + $0x38] sm:$0xff]  ;;  %v152_v11 = vld [vmem:[#allocation7 + $0x30] sm:$0xff]  ;;  %v151_v12 = vld [vmem:[#allocation7 + $0x28] sm:$0xff]  ;;  %s322_s9 = sshll.u32 %s618_s7, 4  ;;  %s323_s9 = int_to_ptr.hbm [resolvable:$true] %s322_s9 }
  0x20   :  { %v150_v13 = vld [vmem:[#allocation7 + $0x20] sm:$0xff]  ;;  %v149_v14 = vld [vmem:[#allocation7 + $0x18] sm:$0xff]  ;;  %v148_v15 = vld [vmem:[#allocation7 + $0x10] sm:$0xff] }
  0x21   :  { %168 = vmatpush.msra.mxu1 %v159_v4  ;;  %v147_v16 = vld [vmem:[#allocation7 + $0x8] sm:$0xff]  ;;  %v146_v17 = vld [vmem:[#allocation7] sm:$0xff]  ;;  %v348_v20 = vld [vmem:[%s614_s3] ss:$0 sm:$0xff]  ;;  %s539_s3 = smov [#allocation13]  }
  0x22   :  { %v208_v27 = vld [vmem:[#allocation8] sm:$0xf]  ;;  %v254_v30 = vld [vmem:[#allocation10 + $0x70] sm:$0xff]  ;;  %v253_v32 = vld [vmem:[#allocation10 + $0x68] sm:$0xff]  ;;  %s320_s29 = sshll.u32 %s539_s3, 4  ;;  %s321_s29 = int_to_ptr.vmem [resolvable:$true] %s320_s29 }
  0x23   :  { %169 = vmatpush.msra.mxu1 %v158_v5  ;;  %337 = vmatpush.msk.msrb.mxu2 %vm213_vm6, %v208_v27  ;;  %v255_v28 = vld [vmem:[#allocation10 + $0x78] sm:$0xff]  ;;  %v290_v31 = vld [vmem:[#allocation11 + $0x70] sm:$0xff]  ;;  %v289_v33 = vld [vmem:[#allocation11 + $0x68] sm:$0xff] }
  0x24   :  { %v291_v29 = vld [vmem:[#allocation11 + $0x78] sm:$0xff]  ;;  %256 = vmatpush.msra.mxu3 %v255_v28  ;;  %v252_v34 = vld [vmem:[#allocation10 + $0x60] sm:$0xff]  ;;  %v250_v38 = vld [vmem:[#allocation10 + $0x50] sm:$0xff] }
  0x25   :  { %170 = vmatpush.msra.mxu1 %v157_v6  ;;  %292 = vmatpush.msra.mxu0 %v291_v29  ;;  %v288_v35 = vld [vmem:[#allocation11 + $0x60] sm:$0xff]  ;;  %v251_v36 = vld [vmem:[#allocation10 + $0x58] sm:$0xff]  ;;  %v286_v39 = vld [vmem:[#allocation11 + $0x50] sm:$0xff] }
  0x26   :  { %257 = vmatpush.msra.mxu3 %v254_v30  ;;  %v287_v37 = vld [vmem:[#allocation11 + $0x58] sm:$0xff]  ;;  %v249_v40 = vld [vmem:[#allocation10 + $0x48] sm:$0xff]  ;;  %v248_v42 = vld [vmem:[#allocation10 + $0x40] sm:$0xff] }
  0x27   :  { %171 = vmatpush.msra.mxu1 %v156_v7  ;;  %293 = vmatpush.msra.mxu0 %v290_v31  ;;  %v285_v41 = vld [vmem:[#allocation11 + $0x48] sm:$0xff]  ;;  %v284_v43 = vld [vmem:[#allocation11 + $0x40] sm:$0xff]  ;;  %v247_v44 = vld [vmem:[#allocation10 + $0x38] sm:$0xff] }
  0x28   :  { %258 = vmatpush.msra.mxu3 %v253_v32  ;;  %v283_v45 = vld [vmem:[#allocation11 + $0x38] sm:$0xff]  ;;  %v246_v46 = vld [vmem:[#allocation10 + $0x30] sm:$0xff]  ;;  %v245_v55 = vld [vmem:[#allocation10 + $0x28] sm:$0xff] }
  0x29   :  { %172 = vmatpush.msra.mxu1 %v155_v8  ;;  %294 = vmatpush.msra.mxu0 %v289_v33  ;;  %v282_v47 = vld [vmem:[#allocation11 + $0x30] sm:$0xff]  ;;  %v281_v56 = vld [vmem:[#allocation11 + $0x28] sm:$0xff]  ;;  %v244_v57 = vld [vmem:[#allocation10 + $0x20] sm:$0xff] }
  0x2a   :  { %259 = vmatpush.msra.mxu3 %v252_v34  ;;  %v280_v58 = vld [vmem:[#allocation11 + $0x20] sm:$0xff]  ;;  %v243_v59 = vld [vmem:[#allocation10 + $0x18] sm:$0xff]  ;;  %v242_v61 = vld [vmem:[#allocation10 + $0x10] sm:$0xff] }
  0x2b   :  { %173 = vmatpush.msra.mxu1 %v154_v9  ;;  %295 = vmatpush.msra.mxu0 %v288_v35  ;;  %v279_v60 = vld [vmem:[#allocation11 + $0x18] sm:$0xff]  ;;  %v278_v62 = vld [vmem:[#allocation11 + $0x10] sm:$0xff]  ;;  %v241_v63 = vld [vmem:[#allocation10 + $0x8] sm:$0xff] }
  0x2c   :  { %260 = vmatpush.msra.mxu3 %v251_v36  ;;  %v277_v0 = vld [vmem:[#allocation11 + $0x8] sm:$0xff]  ;;  %v240_v1 = vld [vmem:[#allocation10] sm:$0xff] }
  0x2d   :  { %174 = vmatpush.msra.mxu1 %v153_v10  ;;  %296 = vmatpush.msra.mxu0 %v287_v37  ;;  %v276_v2 = vld [vmem:[#allocation11] sm:$0xff] }
  0x2e   :  { %261 = vmatpush.msra.mxu3 %v250_v38 }
  0x2f   :  { %175 = vmatpush.msra.mxu1 %v152_v11  ;;  %297 = vmatpush.msra.mxu0 %v286_v39 }
  0x30   :  { %262 = vmatpush.msra.mxu3 %v249_v40 }
  0x31   :  { %176 = vmatpush.msra.mxu1 %v151_v12  ;;  %298 = vmatpush.msra.mxu0 %v285_v41 }
  0x32   :  { %263 = vmatpush.msra.mxu3 %v248_v42 }
  0x33   :  { %177 = vmatpush.msra.mxu1 %v150_v13  ;;  %299 = vmatpush.msra.mxu0 %v284_v43 }
  0x34   :  { %264 = vmatpush.msra.mxu3 %v247_v44 }
  0x35   :  { %178 = vmatpush.msra.mxu1 %v149_v14  ;;  %300 = vmatpush.msra.mxu0 %v283_v45 }
  0x36   :  { %265 = vmatpush.msra.mxu3 %v246_v46 }
  0x37   :  { %179 = vmatpush.msra.mxu1 %v148_v15  ;;  %301 = vmatpush.msra.mxu0 %v282_v47 }
  0x38   :  { %266 = vmatpush.msra.mxu3 %v245_v55 }
  0x39   :  { %180 = vmatpush.msra.mxu1 %v147_v16  ;;  %302 = vmatpush.msra.mxu0 %v281_v56 }
  0x3a   :  { %267 = vmatpush.msra.mxu3 %v244_v57 }
  0x3b   :  { %181 = vmatpush.msra.mxu1 %v146_v17  ;;  %303 = vmatpush.msra.mxu0 %v280_v58 }
  0x3c   :  { %268 = vmatpush.msra.mxu3 %v243_v59 }
  0x3d   :  { %304 = vmatpush.msra.mxu0 %v279_v60 }
  0x3e   :  { %269 = vmatpush.msra.mxu3 %v242_v61 }
  0x3f   :  { %305 = vmatpush.msra.mxu0 %v278_v62 }
  0x40   :  { %270 = vmatpush.msra.mxu3 %v241_v63 }
  0x41   :  { %306 = vmatpush.msra.mxu0 %v277_v0 }
  0x42   :  { %271 = vmatpush.msra.mxu3 %v240_v1 }
  0x43   :  { %307 = vmatpush.msra.mxu0 %v276_v2 }
  0xa0   :  { %v142_v18 = vpop.f32.mrf.mxu2 }
  0xa1   :  { %v145_v19 = vmax.f32 %v142_v18, 0.0 }
  0xa3   :  { %182 = vmatmul.f32.vlgmr.msra.gmra.mxu1 %v145_v19 }
 0x120   :  { %v183_v21 = vpop.f32.mrf.mxu1 }
 0x121   :  { %v601_v22 = vadd.f32 %v348_v20, %v183_v21 }
 0x123   :  { %v195_v23 = vsel %vm194_vm2, %v601_v22, -inf  ;;  %v187_v24 = vsel %vm186_vm3, %v601_v22, -inf  ;;  %v199_v25 = vsel %vm198_vm4, %v601_v22, -inf  ;;  %v191_v26 = vsel %vm190_vm5, %v601_v22, -inf }
 0x124   :  { %196 = vmax.xlane.f32.xlu1 %v195_v23  ;;  %188 = vmax.xlane.f32.xlu0 %v187_v24 }
 0x12c   :  { %200 = vmax.xlane.f32.xlu1 %v199_v25  ;;  %192 = vmax.xlane.f32.xlu0 %v191_v26 }
 0x197   :  { %v197_v48 = vpop.xlane.xlu1 %196  ;;  %v189_v49 = vpop.xlane.xlu0 %188 }
 0x19f   :  { %v193_v50 = vpop.xlane.xlu0 %192  ;;  %v201_v52 = vpop.xlane.xlu1 %200 }
 0x1a0   :  { %v203_v51 = vsel %vm202_vm7, %v189_v49, %v193_v50 }
 0x1a1   :  { %v205_v53 = vsel %vm204_vm8, %v203_v51, %v197_v48 }
 0x1a2   :  { %v207_v54 = vsel %vm206_vm9, %v205_v53, %v201_v52 }
 0x1a3   :  { %338 = vmatmul.msk.f32.vlgmr.msrb.gmra.mxu2 %vm209_vm10, %v207_v54 }
 0x226   :  { %v234_v3 = vpop.f32.mrf.mxu2 }
 0x227   :  { %v237_v4 = vsub.f32 %v601_v22, %v234_v3 }
 0x229   :  { %v238_v5 = vmul.f32 1.442695, %v237_v4 }
 0x22b   :  { %349 = vpow2.f32 %v238_v5 }
 0x231   :  { %v350_v6 = vpop.eup %349 }
 0x232   :  { %272 = vmatmul.f32.vlgmr.msra.gmra.mxu3 %v350_v6  ;;  %308 = vmatmul.f32.vlgmr.msra.gmra.mxu0 %v350_v6 }
 0x2af   :  { %v309_v7 = vpop.f32.mrf.mxu0 }
 0x2b0   :  { %351 = vrcp.f32 %v309_v7 }
 0x2b5   :  { %v273_v8 = vpop.f32.mrf.mxu3 }
 0x2b6   :  { %v352_v9 = vpop.eup %351 }
 0x2b7   :  { %v313_v10 = vmul.f32 %v352_v9, %v273_v8 }
 0x2b9   :  { %314 = vst [vmem:[#allocation13] sm:$0xff] %v313_v10 }
 0x2ba   :  { %325 = dma.vmem_to_hbm [thread:$0]  %s321_s29, 128, %s323_s9, [#allocation4]  }
 0x2bb   :  { %529 = dma.done.wait [#allocation4], 128  }
 0x2bc   :  { %530 = vsyncadd [#allocation4], 4294967168 }
 0x2bd   :  { %330 = vsyncpa [#allocation3], 1 }
 0x2be   :  { %331 = vsyncpa [#allocation6], 1 }
 0x2bf   :  { %332 = vsyncpa [#allocation9], 1 }
 0x2c0   :  { %333 = vsyncpa [#allocation12], 1 }
 0x2c1   :  { %334 = vsyncpa [#allocation4], 1 }

</bundles_post_ra>
